<compile_context>
chip_gen: v6e
topology: v6e:2x2x1
jax: 0.10.0
libtpu: 0.0.40
codegen_flags: <defaults>
</compile_context>

<pallas_src>
import functools

import jax
import jax.numpy as jnp
from jax.experimental import pallas as pl
from jax.experimental.pallas import tpu as pltpu

IN_DIM = 28 * 28            # 784
DIMS = [IN_DIM, 128, 64, 32, 64, 128, IN_DIM]


def autoencoder_kernel(x_ref,
                       w1, b1, w2, b2, w3, b3,   # encoder params (bf16 W, f32 b)
                       w4, b4, w5, b5, w6, b6,   # decoder params
                       o_ref):
    """Fused forward pass for one batch tile. Everything lives in VMEM.

    All dots use bf16 operands with f32 accumulation on the MXU; the ReLU and
    the bf16 downcast for the next layer's operand are fused.
    """

    def linear(h_bf16, w_ref, b_ref):
        return jnp.dot(h_bf16, w_ref[...],
                       preferred_element_type=jnp.float32) + b_ref[...]

    def relu_bf16(z):
        return jnp.maximum(z, 0.0).astype(jnp.bfloat16)

    h = x_ref[...].astype(jnp.bfloat16)           # (tile_b, 784) bf16
    # Encoder: Linear+ReLU x3
    h = relu_bf16(linear(h, w1, b1))
    h = relu_bf16(linear(h, w2, b2))
    h = relu_bf16(linear(h, w3, b3))
    # Decoder: Linear+ReLU x2, then Linear+Sigmoid
    h = relu_bf16(linear(h, w4, b4))
    h = relu_bf16(linear(h, w5, b5))
    z = linear(h, w6, b6)                         # f32
    o_ref[...] = jax.nn.sigmoid(z).astype(o_ref.dtype)


def make_params(key):
    """Deterministic init mimicking PyTorch nn.Linear default:
    U(-1/sqrt(fan_in), 1/sqrt(fan_in)) for both weight and bias. Stored f32."""
    params = []
    for fan_in, fan_out in zip(DIMS[:-1], DIMS[1:]):
        key, kw, kb = jax.random.split(key, 3)
        bound = 1.0 / jnp.sqrt(float(fan_in))
        w = jax.random.uniform(kw, (fan_in, fan_out), jnp.float32, -bound, bound)
        b = jax.random.uniform(kb, (1, fan_out), jnp.float32, -bound, bound)
        params.append((w, b))
    return params


def _round_up(n, m):
    return (n + m - 1) // m * m


@functools.partial(jax.jit, static_argnames=("tile_b", "out_dtype"))
def autoencoder_forward(x, params, *, tile_b=512, out_dtype=None):
    """tile_b is the main tuning knob (512 is a good default for v5e/v6e/v7x;
    push to 1024 on v6e only — on v5e that needs a vmem_limit_bytes bump).
    out_dtype defaults to x.dtype (f32, matching the PyTorch module); pass
    jnp.bfloat16 to halve the dominant output HBM stream if downstream
    tolerates it."""
    B, F = x.shape
    assert F == IN_DIM
    if out_dtype is None:
        out_dtype = x.dtype

    # Tile: multiple of 8 sublanes; keep the grid >= 2 "parallel" steps when
    # possible so both TensorCores get work on v7x. No batch padding — the
    # ragged last block is masked by Pallas.
    tile = max(8, min(tile_b, _round_up(pl.cdiv(B, 2), 8)))
    grid = (pl.cdiv(B, tile),)

    # Params: bf16 weights (halve their HBM traffic, bf16 MXU operands),
    # f32 biases. No padding anywhere — 784 is a legal full-dim block.
    flat_params = []
    for w, b in params:
        flat_params.append(w.astype(jnp.bfloat16))
        flat_params.append(b.astype(jnp.float32))

    # Whole weight/bias arrays kept resident (constant index maps). ndim bound
    # as a default arg to avoid the late-binding-lambda bug.
    param_specs = [
        pl.BlockSpec(p.shape, lambda i, nd=p.ndim: (0,) * nd)
        for p in flat_params
    ]

    out = pl.pallas_call(
        autoencoder_kernel,
        out_shape=jax.ShapeDtypeStruct((B, IN_DIM), out_dtype),
        grid_spec=pltpu.PrefetchScalarGridSpec(
            num_scalar_prefetch=0,
            grid=grid,
            in_specs=[pl.BlockSpec((tile, IN_DIM), lambda i: (i, 0))]
                     + param_specs,
            out_specs=pl.BlockSpec((tile, IN_DIM), lambda i: (i, 0)),
        ),
        compiler_params=pltpu.CompilerParams(
            dimension_semantics=("parallel",)),
    )(x, *flat_params)

    return out


def reference_forward(x, params):
    """Pure-JAX reference with the same numerics (bf16 operands, f32 accum,
    bf16 post-ReLU activations)."""
    h = x.astype(jnp.bfloat16)
    for li, (w, b) in enumerate(params):
        z = jnp.dot(h, w.astype(jnp.bfloat16),
                    preferred_element_type=jnp.float32) + b
        if li < len(params) - 1:
            h = jnp.maximum(z, 0.0).astype(jnp.bfloat16)
        else:
            h = jax.nn.sigmoid(z)
    return h


if __name__ == "__main__":
    key = jax.random.PRNGKey(0)
    key, kx, kp = jax.random.split(key, 3)

    B = 16
    x = jax.random.normal(kx, (B, IN_DIM), dtype=jnp.float32)
    params = make_params(kp)

    out = autoencoder_forward(x, params)
    out = jax.block_until_ready(out)

    ref = reference_forward(x, params)
    assert out.shape == (B, IN_DIM)
    assert out.dtype == x.dtype
    max_err = jnp.max(jnp.abs(out - ref))
    assert jnp.allclose(out, ref, atol=5e-3, rtol=0), f"max abs err {max_err}"

    print("KERNEL_OK")
</pallas_src>

<mosaic_0001>
module attributes {stable_mosaic.version = 11 : i64} {
  func.func @autoencoder_kernel(%arg0: i32, %arg1: memref<8x784xf32, #tpu.memory_space<vmem>>, %arg2: memref<784x128xbf16, #tpu.memory_space<vmem>>, %arg3: memref<1x128xf32, #tpu.memory_space<vmem>>, %arg4: memref<128x64xbf16, #tpu.memory_space<vmem>>, %arg5: memref<1x64xf32, #tpu.memory_space<vmem>>, %arg6: memref<64x32xbf16, #tpu.memory_space<vmem>>, %arg7: memref<1x32xf32, #tpu.memory_space<vmem>>, %arg8: memref<32x64xbf16, #tpu.memory_space<vmem>>, %arg9: memref<1x64xf32, #tpu.memory_space<vmem>>, %arg10: memref<64x128xbf16, #tpu.memory_space<vmem>>, %arg11: memref<1x128xf32, #tpu.memory_space<vmem>>, %arg12: memref<128x784xbf16, #tpu.memory_space<vmem>>, %arg13: memref<1x784xf32, #tpu.memory_space<vmem>>, %arg14: memref<8x784xf32, #tpu.memory_space<vmem>>) attributes {dimension_semantics = [#tpu.dimension_semantics<parallel>], iteration_bounds = array<i64: 2>, scalar_prefetch = 0 : i64, scratch_operands = 0 : i64, tpu.core_type = #tpu.core_type<tc>, window_params = [{transform_indices = @transform_0, window_bounds = array<i64: 8, 784>}, {pipeline_mode = #tpu.pipeline_mode<synchronous>, transform_indices = @transform_1, window_bounds = array<i64: 784, 128>}, {pipeline_mode = #tpu.pipeline_mode<synchronous>, transform_indices = @transform_2, window_bounds = array<i64: 1, 128>}, {pipeline_mode = #tpu.pipeline_mode<synchronous>, transform_indices = @transform_3, window_bounds = array<i64: 128, 64>}, {pipeline_mode = #tpu.pipeline_mode<synchronous>, transform_indices = @transform_4, window_bounds = array<i64: 1, 64>}, {pipeline_mode = #tpu.pipeline_mode<synchronous>, transform_indices = @transform_5, window_bounds = array<i64: 64, 32>}, {pipeline_mode = #tpu.pipeline_mode<synchronous>, transform_indices = @transform_6, window_bounds = array<i64: 1, 32>}, {pipeline_mode = #tpu.pipeline_mode<synchronous>, transform_indices = @transform_7, window_bounds = array<i64: 32, 64>}, {pipeline_mode = #tpu.pipeline_mode<synchronous>, transform_indices = @transform_8, window_bounds = array<i64: 1, 64>}, {pipeline_mode = #tpu.pipeline_mode<synchronous>, transform_indices = @transform_9, window_bounds = array<i64: 64, 128>}, {pipeline_mode = #tpu.pipeline_mode<synchronous>, transform_indices = @transform_10, window_bounds = array<i64: 1, 128>}, {pipeline_mode = #tpu.pipeline_mode<synchronous>, transform_indices = @transform_11, window_bounds = array<i64: 128, 784>}, {pipeline_mode = #tpu.pipeline_mode<synchronous>, transform_indices = @transform_12, window_bounds = array<i64: 1, 784>}, {transform_indices = @transform_13, window_bounds = array<i64: 8, 784>}]} {
    %c0 = arith.constant 0 : index
    %c0_0 = arith.constant 0 : index
    %0 = vector.load %arg1[%c0, %c0_0] : memref<8x784xf32, #tpu.memory_space<vmem>>, vector<8x784xf32>
    %1 = arith.truncf %0 : vector<8x784xf32> to vector<8x784xbf16>
    %c0_1 = arith.constant 0 : index
    %c0_2 = arith.constant 0 : index
    %2 = vector.load %arg2[%c0_1, %c0_2] : memref<784x128xbf16, #tpu.memory_space<vmem>>, vector<784x128xbf16>
    %cst = arith.constant dense<0.000000e+00> : vector<8x128xf32>
    %3 = tpu.matmul %1, %2, %cst {dimension_numbers = #tpu.dot_dimension_numbers<[1], [0], [0], [1], [0, 0, 1, 1], [], []>} : vector<8x784xbf16>, vector<784x128xbf16>, vector<8x128xf32> -> vector<8x128xf32>
    %c0_3 = arith.constant 0 : index
    %c0_4 = arith.constant 0 : index
    %4 = vector.load %arg3[%c0_3, %c0_4] : memref<1x128xf32, #tpu.memory_space<vmem>>, vector<1x128xf32>
    %5 = vector.broadcast %4 : vector<1x128xf32> to vector<8x128xf32>
    %6 = arith.addf %3, %5 : vector<8x128xf32>
    %cst_5 = arith.constant 0.000000e+00 : f32
    %7 = vector.broadcast %cst_5 : f32 to vector<8x128xf32>
    %8 = arith.maximumf %6, %7 : vector<8x128xf32>
    %9 = arith.truncf %8 : vector<8x128xf32> to vector<8x128xbf16>
    %c0_6 = arith.constant 0 : index
    %c0_7 = arith.constant 0 : index
    %10 = vector.load %arg4[%c0_6, %c0_7] : memref<128x64xbf16, #tpu.memory_space<vmem>>, vector<128x64xbf16>
    %cst_8 = arith.constant dense<0.000000e+00> : vector<8x64xf32>
    %11 = tpu.matmul %9, %10, %cst_8 {dimension_numbers = #tpu.dot_dimension_numbers<[1], [0], [0], [1], [0, 0, 1, 1], [], []>} : vector<8x128xbf16>, vector<128x64xbf16>, vector<8x64xf32> -> vector<8x64xf32>
    %c0_9 = arith.constant 0 : index
    %c0_10 = arith.constant 0 : index
    %12 = vector.load %arg5[%c0_9, %c0_10] : memref<1x64xf32, #tpu.memory_space<vmem>>, vector<1x64xf32>
    %13 = vector.broadcast %12 : vector<1x64xf32> to vector<8x64xf32>
    %14 = arith.addf %11, %13 : vector<8x64xf32>
    %cst_11 = arith.constant 0.000000e+00 : f32
    %15 = vector.broadcast %cst_11 : f32 to vector<8x64xf32>
    %16 = arith.maximumf %14, %15 : vector<8x64xf32>
    %17 = arith.truncf %16 : vector<8x64xf32> to vector<8x64xbf16>
    %c0_12 = arith.constant 0 : index
    %c0_13 = arith.constant 0 : index
    %18 = vector.load %arg6[%c0_12, %c0_13] : memref<64x32xbf16, #tpu.memory_space<vmem>>, vector<64x32xbf16>
    %cst_14 = arith.constant dense<0.000000e+00> : vector<8x32xf32>
    %19 = tpu.matmul %17, %18, %cst_14 {dimension_numbers = #tpu.dot_dimension_numbers<[1], [0], [0], [1], [0, 0, 1, 1], [], []>} : vector<8x64xbf16>, vector<64x32xbf16>, vector<8x32xf32> -> vector<8x32xf32>
    %c0_15 = arith.constant 0 : index
    %c0_16 = arith.constant 0 : index
    %20 = vector.load %arg7[%c0_15, %c0_16] : memref<1x32xf32, #tpu.memory_space<vmem>>, vector<1x32xf32>
    %21 = vector.broadcast %20 : vector<1x32xf32> to vector<8x32xf32>
    %22 = arith.addf %19, %21 : vector<8x32xf32>
    %cst_17 = arith.constant 0.000000e+00 : f32
    %23 = vector.broadcast %cst_17 : f32 to vector<8x32xf32>
    %24 = arith.maximumf %22, %23 : vector<8x32xf32>
    %25 = arith.truncf %24 : vector<8x32xf32> to vector<8x32xbf16>
    %c0_18 = arith.constant 0 : index
    %c0_19 = arith.constant 0 : index
    %26 = vector.load %arg8[%c0_18, %c0_19] : memref<32x64xbf16, #tpu.memory_space<vmem>>, vector<32x64xbf16>
    %cst_20 = arith.constant dense<0.000000e+00> : vector<8x64xf32>
    %27 = tpu.matmul %25, %26, %cst_20 {dimension_numbers = #tpu.dot_dimension_numbers<[1], [0], [0], [1], [0, 0, 1, 1], [], []>} : vector<8x32xbf16>, vector<32x64xbf16>, vector<8x64xf32> -> vector<8x64xf32>
    %c0_21 = arith.constant 0 : index
    %c0_22 = arith.constant 0 : index
    %28 = vector.load %arg9[%c0_21, %c0_22] : memref<1x64xf32, #tpu.memory_space<vmem>>, vector<1x64xf32>
    %29 = vector.broadcast %28 : vector<1x64xf32> to vector<8x64xf32>
    %30 = arith.addf %27, %29 : vector<8x64xf32>
    %cst_23 = arith.constant 0.000000e+00 : f32
    %31 = vector.broadcast %cst_23 : f32 to vector<8x64xf32>
    %32 = arith.maximumf %30, %31 : vector<8x64xf32>
    %33 = arith.truncf %32 : vector<8x64xf32> to vector<8x64xbf16>
    %c0_24 = arith.constant 0 : index
    %c0_25 = arith.constant 0 : index
    %34 = vector.load %arg10[%c0_24, %c0_25] : memref<64x128xbf16, #tpu.memory_space<vmem>>, vector<64x128xbf16>
    %cst_26 = arith.constant dense<0.000000e+00> : vector<8x128xf32>
    %35 = tpu.matmul %33, %34, %cst_26 {dimension_numbers = #tpu.dot_dimension_numbers<[1], [0], [0], [1], [0, 0, 1, 1], [], []>} : vector<8x64xbf16>, vector<64x128xbf16>, vector<8x128xf32> -> vector<8x128xf32>
    %c0_27 = arith.constant 0 : index
    %c0_28 = arith.constant 0 : index
    %36 = vector.load %arg11[%c0_27, %c0_28] : memref<1x128xf32, #tpu.memory_space<vmem>>, vector<1x128xf32>
    %37 = vector.broadcast %36 : vector<1x128xf32> to vector<8x128xf32>
    %38 = arith.addf %35, %37 : vector<8x128xf32>
    %cst_29 = arith.constant 0.000000e+00 : f32
    %39 = vector.broadcast %cst_29 : f32 to vector<8x128xf32>
    %40 = arith.maximumf %38, %39 : vector<8x128xf32>
    %41 = arith.truncf %40 : vector<8x128xf32> to vector<8x128xbf16>
    %c0_30 = arith.constant 0 : index
    %c0_31 = arith.constant 0 : index
    %42 = vector.load %arg12[%c0_30, %c0_31] : memref<128x784xbf16, #tpu.memory_space<vmem>>, vector<128x784xbf16>
    %cst_32 = arith.constant dense<0.000000e+00> : vector<8x784xf32>
    %43 = tpu.matmul %41, %42, %cst_32 {dimension_numbers = #tpu.dot_dimension_numbers<[1], [0], [0], [1], [0, 0, 1, 1], [], []>} : vector<8x128xbf16>, vector<128x784xbf16>, vector<8x784xf32> -> vector<8x784xf32>
    %c0_33 = arith.constant 0 : index
    %c0_34 = arith.constant 0 : index
    %44 = vector.load %arg13[%c0_33, %c0_34] : memref<1x784xf32, #tpu.memory_space<vmem>>, vector<1x784xf32>
    %45 = vector.broadcast %44 : vector<1x784xf32> to vector<8x784xf32>
    %46 = arith.addf %43, %45 : vector<8x784xf32>
    %47 = arith.negf %46 : vector<8x784xf32>
    %48 = math.exp %47 : vector<8x784xf32>
    %cst_35 = arith.constant 1.000000e+00 : f32
    %49 = vector.broadcast %cst_35 : f32 to vector<8x784xf32>
    %50 = arith.addf %49, %48 : vector<8x784xf32>
    %51 = arith.divf %49, %50 : vector<8x784xf32>
    %c0_36 = arith.constant 0 : index
    %c0_37 = arith.constant 0 : index
    %52 = vector.load %arg14[%c0_36, %c0_37] : memref<8x784xf32, #tpu.memory_space<vmem>>, vector<8x784xf32>
    tpu.vector_store %arg14[%c0_36, %c0_37], %51 {strides = array<i32>} : memref<8x784xf32, #tpu.memory_space<vmem>>, vector<8x784xf32>,
    return
  }
  func.func @transform_0(%arg0: i32) -> (i32, i32) {
    %c0_i32 = arith.constant 0 : i32
    %c0_i32_0 = arith.constant 0 : i32
    return %arg0, %c0_i32 : i32, i32
  }
  func.func @transform_1(%arg0: i32) -> (i32, i32) {
    %c0_i32 = arith.constant 0 : i32
    %c0_i32_0 = arith.constant 0 : i32
    %c0_i32_1 = arith.constant 0 : i32
    return %c0_i32, %c0_i32_0 : i32, i32
  }
  func.func @transform_2(%arg0: i32) -> (i32, i32) {
    %c0_i32 = arith.constant 0 : i32
    %c0_i32_0 = arith.constant 0 : i32
    %c0_i32_1 = arith.constant 0 : i32
    return %c0_i32, %c0_i32_0 : i32, i32
  }
  func.func @transform_3(%arg0: i32) -> (i32, i32) {
    %c0_i32 = arith.constant 0 : i32
    %c0_i32_0 = arith.constant 0 : i32
    %c0_i32_1 = arith.constant 0 : i32
    return %c0_i32, %c0_i32_0 : i32, i32
  }
  func.func @transform_4(%arg0: i32) -> (i32, i32) {
    %c0_i32 = arith.constant 0 : i32
    %c0_i32_0 = arith.constant 0 : i32
    %c0_i32_1 = arith.constant 0 : i32
    return %c0_i32, %c0_i32_0 : i32, i32
  }
  func.func @transform_5(%arg0: i32) -> (i32, i32) {
    %c0_i32 = arith.constant 0 : i32
    %c0_i32_0 = arith.constant 0 : i32
    %c0_i32_1 = arith.constant 0 : i32
    return %c0_i32, %c0_i32_0 : i32, i32
  }
  func.func @transform_6(%arg0: i32) -> (i32, i32) {
    %c0_i32 = arith.constant 0 : i32
    %c0_i32_0 = arith.constant 0 : i32
    %c0_i32_1 = arith.constant 0 : i32
    return %c0_i32, %c0_i32_0 : i32, i32
  }
  func.func @transform_7(%arg0: i32) -> (i32, i32) {
    %c0_i32 = arith.constant 0 : i32
    %c0_i32_0 = arith.constant 0 : i32
    %c0_i32_1 = arith.constant 0 : i32
    return %c0_i32, %c0_i32_0 : i32, i32
  }
  func.func @transform_8(%arg0: i32) -> (i32, i32) {
    %c0_i32 = arith.constant 0 : i32
    %c0_i32_0 = arith.constant 0 : i32
    %c0_i32_1 = arith.constant 0 : i32
    return %c0_i32, %c0_i32_0 : i32, i32
  }
  func.func @transform_9(%arg0: i32) -> (i32, i32) {
    %c0_i32 = arith.constant 0 : i32
    %c0_i32_0 = arith.constant 0 : i32
    %c0_i32_1 = arith.constant 0 : i32
    return %c0_i32, %c0_i32_0 : i32, i32
  }
  func.func @transform_10(%arg0: i32) -> (i32, i32) {
    %c0_i32 = arith.constant 0 : i32
    %c0_i32_0 = arith.constant 0 : i32
    %c0_i32_1 = arith.constant 0 : i32
    return %c0_i32, %c0_i32_0 : i32, i32
  }
  func.func @transform_11(%arg0: i32) -> (i32, i32) {
    %c0_i32 = arith.constant 0 : i32
    %c0_i32_0 = arith.constant 0 : i32
    %c0_i32_1 = arith.constant 0 : i32
    return %c0_i32, %c0_i32_0 : i32, i32
  }
  func.func @transform_12(%arg0: i32) -> (i32, i32) {
    %c0_i32 = arith.constant 0 : i32
    %c0_i32_0 = arith.constant 0 : i32
    %c0_i32_1 = arith.constant 0 : i32
    return %c0_i32, %c0_i32_0 : i32, i32
  }
  func.func @transform_13(%arg0: i32) -> (i32, i32) {
    %c0_i32 = arith.constant 0 : i32
    %c0_i32_0 = arith.constant 0 : i32
    return %arg0, %c0_i32 : i32, i32
  }
}

</mosaic_0001>

<bundles_post_ra>
// kernel: autoencoder_forward.1
= control target key start
LH: loop header
LB: loop body
LE: loop exit
PB: predicated region body
PF: predicated region fallthrough
CT: control target
= control target key end

     0   :  { %18 = vsyncpa [#allocation3], 0  ;;  %s3277_s0 = inlined_call_operand.vmem [shape: f32[16,784], index: 0, kind: input, shape index: {}]   ;;  %s3278_s1 = inlined_call_operand.vmem [shape: bf16[784,128], index: 1, kind: input, shape index: {}]   ;;  %s3279_s2 = inlined_call_operand.vmem [shape: f32[1,128], index: 2, kind: input, shape index: {}]   ;;  %s3280_s3 = inlined_call_operand.vmem [shape: bf16[128,64], index: 3, kind: input, shape index: {}]   ;;  %s3281_s4 = inlined_call_operand.vmem [shape: f32[1,64], index: 4, kind: input, shape index: {}]   ;;  %s3282_s5 = inlined_call_operand.vmem [shape: bf16[64,32], index: 5, kind: input, shape index: {}]   ;;  %s3283_s6 = inlined_call_operand.vmem [shape: f32[1,32], index: 6, kind: input, shape index: {}]   ;;  %s3284_s7 = inlined_call_operand.vmem [shape: bf16[32,64], index: 7, kind: input, shape index: {}]   ;;  %s3285_s8 = inlined_call_operand.vmem [shape: f32[1,64], index: 8, kind: input, shape index: {}]   ;;  %s3286_s9 = inlined_call_operand.vmem [shape: bf16[64,128], index: 9, kind: input, shape index: {}]   ;;  %s3287_s10 = inlined_call_operand.vmem [shape: f32[1,128], index: 10, kind: input, shape index: {}]   ;;  %s3288_s11 = inlined_call_operand.vmem [shape: bf16[128,784], index: 11, kind: input, shape index: {}]   ;;  %s3289_s12 = inlined_call_operand.vmem [shape: f32[1,784], index: 12, kind: input, shape index: {}]   ;;  %s3290_s13 = inlined_call_operand.hbm [shape: f32[16,784], index: 13, kind: output, shape index: {}]  }
   0x1   :  { %20 = vsyncpa [#allocation3 + $0x1], 0  ;;  %s2725_s25 = smov 0   ;;  %s2727_s26 = smov 0  }
   0x2   :  { %s2729_s27 = smov 0   ;;  %s2731_s28 = smov 0  }
   0x3 LB: > { %3294 = sst [smem:[#allocation5_spill]] %s2645_s27  ;;  %s2746_s29 = sadd.s32 4294967295, %s2649_s28   ;;  %s2649_s28 = sphi %s2731_s28, %s3299_s28   ;;  %s2645_s27 = sphi %s2729_s27, %s3304_s27   ;;  %s2641_s26 = sphi %s2727_s26, %s3303_s26   ;;  %s2637_s25 = sphi %s2725_s25, %s3302_s25  }
   0x4   : > { %s2045_s30 = sadd.s32 4294967294, %s2649_s28   ;;  %s2750_s14 = sadd.s32 1, %s2649_s28  }
   0x5   : > { %3295 = sst [smem:[#allocation6_spill]] %s2750_s14  ;;  %s311_s15 = sadd.s32 1, %s2645_s27 }
   0x6   : > { %s308_s16 = ssub.s32 %s2649_s28, %s2750_s14  ;;  %p321_p0 = scmp.ne.s32.totalorder %s2645_s27, %s2641_s26 }
   0x7   : > { %p309_p1 = scmp.eq.s32.totalorder %s308_s16, 0  ;;  %p322_p2 = scmp.eq.s32.totalorder %s2746_s29, 1 }
   0x8   : > { %p327_p3 = scmp.ne.s32.totalorder %s2641_s26, %s2637_s25  ;;  %p328_p4 = scmp.eq.s32.totalorder %s2045_s30, 1 }
   0x9   : > { %s2761_s17 = scalar_select %p309_p1, %s2645_s27, %s311_s15  }
   0xa   : > { %p2763_p5 = por %p322_p2, %p321_p0  ;;  %p2767_p6 = por %p328_p4, %p327_p3 }
   0xb   : > { %3296 = sst [smem:[#allocation7_spill]] %s2761_s17  ;;  %p2048_p7 = scmp.ge.s32.totalorder %s2649_s28, 1 }
   0xc   : > { %p390_p8 = scmp.lt.s32.totalorder %s2649_s28, 3 }
   0xe   : > { %p391_p9 = pnand %p2048_p7, %p390_p8 }
   0xf   : > { %p434_p10 = scmp.lt.s32.totalorder (!%p391_p9), %s2746_s29, 1  ;;  %s431_s16 = sand.u32 (!%p391_p9), 1, %s2641_s26  }
  0x10   : > { %394 = sbr.rel (%p391_p9) target bundleno = 1361 (0x551), region = 72 }
  0x11   : > { %s2369_s27 = smul.u32 (!%p391_p9), 56, %s431_s16 }
  0x13   : > { %s3219_s17 = scalar_lea.vmem (!%p391_p9), [#allocation2], %s2369_s27 }
  0x14   : > { %s1986_s20 = sshll.u32 (!%p391_p9), %s3219_s17, 4  ;;  %s3233_s20 = int_to_ptr.vmem [resolvable:$true] %s1986_s20 }
  0x15   : > { %v2414_v0 = vld [vmem:[%s3278_s1 + $0x78] sm:$0xff]   ;;  %v2418_v4 = vld [vmem:[%s3278_s1 + $0x70] sm:$0xff]   ;;  %v2422_v8 = vld [vmem:[%s3278_s1 + $0x68] sm:$0xff]   ;;  %s435_s22 = scalar_select %p434_p10, %s2746_s29, 1  ;;  %v2651_v44 = vmov 0.0   ;;  %vm2652_vm0 = vmmov 0  }
  0x16   : > { %v2415_v1 = vld [vmem:[%s3278_s1 + $0x38] sm:$0xff]   ;;  %2192 = vmatprep.subr.bf16.mxu0 %v2414_v0  ;;  %v2419_v5 = vld [vmem:[%s3278_s1 + $0x30] sm:$0xff]   ;;  %v2423_v9 = vld [vmem:[%s3278_s1 + $0x28] sm:$0xff]   ;;  %vm853_vm1 = vcmask 130048   ;;  %vm1171_vm2 = vcmask 523264   ;;  %vm1240_vm3 = vcmask 261120  }
  0x17   : > { %v2416_v2 = vld [vmem:[%s3278_s1 + $0xf8] sm:$0xff]   ;;  %2193 = vmatpush3.bf16.msra.mxu0 %v2415_v1  ;;  %v2420_v6 = vld [vmem:[%s3278_s1 + $0xf0] sm:$0xff]   ;;  %v2424_v10 = vld [vmem:[%s3278_s1 + $0xe8] sm:$0xff]   ;;  %s2370_s21 = smul.u32 56, %s435_s22  ;;  %s2589_s15 = scalar_lea.vmem %s3233_s20, 896 }
  0x18   : > { %v2417_v3 = vld [vmem:[%s3278_s1 + $0xb8] sm:$0xff]   ;;  %2214 = vmatprep.subr.bf16.mxu1 %v2416_v2  ;;  %2194 = vmatprep.subr.bf16.mxu0 %v2418_v4  ;;  %v2421_v7 = vld [vmem:[%s3278_s1 + $0xb0] sm:$0xff]   ;;  %v2425_v11 = vld [vmem:[%s3278_s1 + $0xa8] sm:$0xff]   ;;  %s2371_s22 = smul.u32 896, %s2746_s29  ;;  %s1972_s29 = scalar_lea.sflag [#allocation3], %s431_s16 }
  0x19   : > { %2215 = vmatpush3.bf16.msra.mxu1 %v2417_v3  ;;  %v2426_v12 = vld [vmem:[%s3278_s1 + $0x60] sm:$0xff]   ;;  %v2430_v16 = vld [vmem:[%s3278_s1 + $0x58] sm:$0xff]   ;;  %v2434_v20 = vld [vmem:[%s3278_s1 + $0x50] sm:$0xff]   ;;  %s2865_s14 = scalar_lea.vmem %s3277_s0, %s2370_s21  ;;  %p2590_p11 = scmp.ne.s32.totalorder %s3233_s20, %s2589_s15 }
  0x1a   : > { %2216 = vmatprep.subr.bf16.mxu1 %v2420_v6  ;;  %v2427_v13 = vld [vmem:[%s3278_s1 + $0x20] sm:$0xff]   ;;  %v2431_v17 = vld [vmem:[%s3278_s1 + $0x18] sm:$0xff]   ;;  %v2435_v21 = vld [vmem:[%s3278_s1 + $0x10] sm:$0xff]   ;;  %s3231_s30 = scalar_lea.hbm %s3290_s13, %s2371_s22 }
  0x1b   : > { %2195 = vmatpush3.bf16.msra.mxu0 %v2419_v5  ;;  %v2428_v14 = vld [vmem:[%s3278_s1 + $0xe0] sm:$0xff]   ;;  %v2432_v18 = vld [vmem:[%s3278_s1 + $0xd8] sm:$0xff]   ;;  %v2436_v22 = vld [vmem:[%s3278_s1 + $0xd0] sm:$0xff]   ;;  %p2591_p12 = pnand %p2590_p11, %p2763_p5 }
  0x1c   : > { %2196 = vmatprep.subr.bf16.mxu0 %v2422_v8  ;;  %v2429_v15 = vld [vmem:[%s3278_s1 + $0xa0] sm:$0xff]   ;;  %v2433_v19 = vld [vmem:[%s3278_s1 + $0x98] sm:$0xff]   ;;  %v2437_v23 = vld [vmem:[%s3278_s1 + $0x90] sm:$0xff]  }
  0x1d   : > { %2217 = vmatpush3.bf16.msra.mxu1 %v2421_v7  ;;  %v2438_v24 = vld [vmem:[%s3278_s1 + $0x48] sm:$0xff]   ;;  %v2442_v28 = vld [vmem:[%s3278_s1 + $0x40] sm:$0xff]   ;;  %v2446_v36 = vld [vmem:[%s3278_s1 + $0x178] sm:$0xff]   ;;  %p2592_p13 = pneg %p2591_p12 }
  0x1e   : > { %2218 = vmatprep.subr.bf16.mxu1 %v2424_v10  ;;  %v2439_v25 = vld [vmem:[%s3278_s1 + $0x8] sm:$0xff]   ;;  %v2443_v29 = vld [vmem:[%s3278_s1] sm:$0xff]   ;;  %v443_v37 = vld [vmem:[%s2865_s14 + $0x18] sm:$0xff] }
  0x1f   : > { %2197 = vmatpush3.bf16.msra.mxu0 %v2423_v9  ;;  %v2440_v26 = vld [vmem:[%s3278_s1 + $0xc8] sm:$0xff]   ;;  %v2444_v30 = vld [vmem:[%s3278_s1 + $0xc0] sm:$0xff]   ;;  %v450_v38 = vpack.c.bf16 %v443_v37, %v443_v37  ;;  %v2447_v39 = vld [vmem:[%s3278_s1 + $0x138] sm:$0xff]  }
  0x20   : > { %2198 = vmatprep.subr.bf16.mxu0 %v2426_v12  ;;  %v2441_v27 = vld [vmem:[%s3278_s1 + $0x88] sm:$0xff]   ;;  %v2445_v33 = vld [vmem:[%s3278_s1 + $0x80] sm:$0xff]   ;;  %v442_v40 = vld [vmem:[%s2865_s14 + $0x10] sm:$0xff] }
  0x21   : > { %2219 = vmatpush3.bf16.msra.mxu1 %v2425_v11  ;;  %v441_v31 = vld [vmem:[%s2865_s14 + $0x8] sm:$0xff]  ;;  %v440_v34 = vld [vmem:[%s2865_s14] sm:$0xff]  ;;  %929 = vmatprep.mubr.bf16.mxu1 %v450_v38  ;;  %v449_v41 = vpack.c.bf16 %v442_v40, %v442_v40  ;;  %v2448_v42 = vld [vmem:[%s3278_s1 + $0x170] sm:$0xff]  }
  0x22   : > { %2220 = vmatprep.subr.bf16.mxu1 %v2428_v14  ;;  %v448_v32 = vpack.c.bf16 %v441_v31, %v441_v31  ;;  %v447_v35 = vpack.c.bf16 %v440_v34, %v440_v34  ;;  %v2449_v43 = vld [vmem:[%s3278_s1 + $0x130] sm:$0xff]   ;;  %v2450_v45 = vld [vmem:[%s3278_s1 + $0x168] sm:$0xff]   ;;  %v2452_v47 = vld [vmem:[%s3278_s1 + $0x160] sm:$0xff]  }
  0x23   : > { %2199 = vmatpush3.bf16.msra.mxu0 %v2427_v13  ;;  %v2451_v46 = vld [vmem:[%s3278_s1 + $0x128] sm:$0xff]   ;;  %v2453_v48 = vld [vmem:[%s3278_s1 + $0x120] sm:$0xff]   ;;  %v2454_v49 = vld [vmem:[%s3278_s1 + $0x158] sm:$0xff]  }
  0x24   : > { %2200 = vmatprep.subr.bf16.mxu0 %v2430_v16  ;;  %889 = vmatprep.mubr.bf16.mxu0 %v448_v32  ;;  %v2455_v50 = vld [vmem:[%s3278_s1 + $0x118] sm:$0xff]   ;;  %v2456_v51 = vld [vmem:[%s3278_s1 + $0x150] sm:$0xff]   ;;  %v2462_v53 = vld [vmem:[%s3278_s1 + $0x180] sm:$0xff]  }
  0x25   : > { %2221 = vmatpush3.bf16.msra.mxu1 %v2429_v15  ;;  %v2457_v52 = vld [vmem:[%s3278_s1 + $0x110] sm:$0xff]   ;;  %v445_v54 = vld [vmem:[%s2865_s14 + $0x28] sm:$0xff]  ;;  %v2460_v60 = vld [vmem:[%s3278_s1 + $0x140] sm:$0xff]  }
  0x26   : > { %2222 = vmatprep.subr.bf16.mxu1 %v2432_v18  ;;  %v2458_v55 = vld [vmem:[%s3278_s1 + $0x148] sm:$0xff]   ;;  %v452_v56 = vpack.c.bf16 %v445_v54, %v445_v54  ;;  %v446_v57 = vld [vmem:[%s2865_s14 + $0x30] sm:$0xff]  ;;  %v2461_v61 = vld [vmem:[%s3278_s1 + $0x100] sm:$0xff]  }
  0x27   : > { %2201 = vmatpush3.bf16.msra.mxu0 %v2431_v17  ;;  %v453_v58 = vpack.c.bf16 %v446_v57, %v446_v57  ;;  %v2459_v59 = vld [vmem:[%s3278_s1 + $0x108] sm:$0xff]   ;;  %v444_v62 = vld [vmem:[%s2865_s14 + $0x20] sm:$0xff]  ;;  %v2463_v0 = vld [vmem:[%s3280_s3 + $0x38] sm:$0xff]   ;;  %s2654_s14 = smov [#allocation2]  }
  0x28   : > { %2202 = vmatprep.subr.bf16.mxu0 %v2434_v20  ;;  %v451_v63 = vpack.c.bf16 %v444_v62, %v444_v62  ;;  %v2464_v1 = vld [vmem:[%s3280_s3 + $0x30] sm:$0xff]   ;;  %v2465_v2 = vld [vmem:[%s3280_s3 + $0x28] sm:$0xff]   ;;  %v2466_v3 = vld [vmem:[%s3280_s3 + $0x20] sm:$0xff]   ;;  %s2593_s21 = sshll.u32 %s2654_s14, 4  ;;  %s2594_s21 = int_to_ptr.vmem [resolvable:$false] %s2593_s21 }
  0x29   : > { %2223 = vmatpush3.bf16.msra.mxu1 %v2433_v19  ;;  %v2467_v4 = vld [vmem:[%s3280_s3 + $0x18] sm:$0xff]   ;;  %v2468_v5 = vld [vmem:[%s3280_s3 + $0x10] sm:$0xff]   ;;  %v2469_v6 = vld [vmem:[%s3280_s3 + $0x8] sm:$0xff]   ;;  %s2595_s27 = scalar_lea.vmem %s2594_s21, 1792  ;;  %p2596_p0 = scmp.lt.s32.totalorder %s3233_s20, %s2594_s21 }
  0x2a   : > { %2224 = vmatprep.subr.bf16.mxu1 %v2436_v22  ;;  %v2470_v7 = vld [vmem:[%s3280_s3] sm:$0xff]   ;;  %v2471_v8 = vld [vmem:[%s3282_s5 + $0x18] sm:$0xff]   ;;  %v2472_v9 = vld [vmem:[%s3282_s5 + $0x10] sm:$0xff]   ;;  %p2597_p1 = scmp.lt.s32.totalorder %s2595_s27, %s2589_s15 }
  0x2b   : > { %2203 = vmatpush3.bf16.msra.mxu0 %v2435_v21  ;;  %v2474_v37 = vld [vmem:[%s3282_s5] sm:$0xff]   ;;  %v2475_v38 = vld [vmem:[%s3284_s7 + $0x8] sm:$0xff]  }
  0x2c   : > { %2204 = vmatprep.subr.bf16.mxu0 %v2438_v24  ;;  %v2483_v62 = vld [vmem:[%s3288_s11 + $0x18c] ss:$28 sps:$4 sm:$0xff]   ;;  %p2598_p2 = por %p2597_p1, %p2596_p0 }
  0x2d   : > { %2225 = vmatpush3.bf16.msra.mxu1 %v2437_v23  ;;  %v2050_v23 = vld [vmem:[%s3279_s2] ss:$0 sm:$0xff] }
  0x2e   : > { %2226 = vmatprep.subr.bf16.mxu1 %v2440_v26  ;;  %p2599_p3 = pnand %p2598_p2, %p2592_p13 }
  0x2f   : > { %2205 = vmatpush3.bf16.msra.mxu0 %v2439_v25 }
  0x30   : > { %2206 = vmatprep.subr.bf16.mxu0 %v2442_v28 }
  0x31   : > { %2227 = vmatpush3.bf16.msra.mxu1 %v2441_v27 }
  0x32   : > { %2228 = vmatprep.subr.bf16.mxu1 %v2444_v30 }
  0x33   : > { %2207 = vmatpush3.bf16.msra.mxu0 %v2443_v29 }
  0x34   : > { %2236 = vmatprep.subr.bf16.mxu0 %v2446_v36  ;;  %v2473_v36 = vld [vmem:[%s3282_s5 + $0x8] sm:$0xff]  }
  0x35   : > { %2229 = vmatpush3.bf16.msra.mxu1 %v2445_v33 }
  0x36   : > { %890 = vmatmul.mubr.bf16.vlgmr.msra.gmra.mxu0 %v447_v35  ;;  %2291 = vmatprep.subr.bf16.mxu1 %v2651_v44 }
  0x37   : > { %2237 = vmatpush3.bf16.msra.mxu0 %v2447_v39  ;;  %969 = vmatprep.mubr.bf16.mxu0 %v452_v56  ;;  %v2101_v39 = vld [vmem:[%s3281_s4] ss:$0 sm:$0xff] }
  0x38   : > { %930 = vmatmul.mubr.bf16.vlgmr.msra.gmra.mxu1 %v449_v41  ;;  %2238 = vmatprep.subr.bf16.mxu0 %v2448_v42 }
  0x39   : > { %2293 = vmatprep.mubr.msk.bf16.mxu1 %vm2652_vm0, %v2651_v44  ;;  %2292 = vmatpush3.bf16.msra.mxu1 %v2462_v53 }
  0x3a   : > { %2297 = vmatprep.subr.bf16.mxu1 %v2651_v44 }
  0x3b   : > { %2239 = vmatpush3.bf16.msra.mxu0 %v2449_v43 }
  0x3c   : > { %2240 = vmatprep.subr.bf16.mxu0 %v2450_v45 }
  0x3f   : > { %2241 = vmatpush3.bf16.msra.mxu0 %v2451_v46 }
  0x40   : > { %2242 = vmatprep.subr.bf16.mxu0 %v2452_v47  ;;  %2294 = vmatmul.mubr.msk.bf16.vlgmr.msra.gmra.mxu1 %vm853_vm1, %v453_v58 }
  0x41   : > { %2313 = vmatprep.mubr.msk.bf16.mxu1 %vm2652_vm0, %v2651_v44  ;;  %2298 = vmatpush3.bf16.msra.mxu1 %v2463_v0  ;;  %v2489_v0 = vld [vmem:[%s3288_s11 + $0x154] ss:$28 sps:$4 sm:$0xff]  }
  0x42   : > { %2299 = vmatprep.subr.bf16.mxu1 %v2651_v44 }
  0x43   : > { %2243 = vmatpush3.bf16.msra.mxu0 %v2453_v48  ;;  %v2476_v48 = vld [vmem:[%s3284_s7] sm:$0xff]  }
  0x44   : > { %2244 = vmatprep.subr.bf16.mxu0 %v2454_v49  ;;  %v2477_v49 = vld [vmem:[%s3286_s9 + $0x18] sm:$0xff]  }
  0x45   : > { %2300 = vmatpush3.bf16.msra.mxu1 %v2464_v1  ;;  %v2487_v1 = vld [vmem:[%s3288_s11 + $0x150] ss:$28 sps:$4 sm:$0xff]  }
  0x46   : > { %2301 = vmatprep.subr.bf16.mxu1 %v2651_v44 }
  0x47   : > { %2245 = vmatpush3.bf16.msra.mxu0 %v2455_v50  ;;  %v2478_v50 = vld [vmem:[%s3286_s9 + $0x10] sm:$0xff]  }
  0x48   : > { %2246 = vmatprep.subr.bf16.mxu0 %v2456_v51  ;;  %v2110_v51 = vld [vmem:[%s3283_s6] ss:$0 sm:$0xff] }
  0x49   : > { %2302 = vmatpush3.bf16.msra.mxu1 %v2465_v2  ;;  %v2495_v2 = vld [vmem:[%s3288_s11 + $0x11c] ss:$28 sps:$4 sm:$0xff]  }
  0x4a   : > { %2303 = vmatprep.subr.bf16.mxu1 %v2651_v44 }
  0x4b   : > { %2247 = vmatpush3.bf16.msra.mxu0 %v2457_v52 }
  0x4c   : > { %2248 = vmatprep.subr.bf16.mxu0 %v2458_v55 }
  0x4d   : > { %2304 = vmatpush3.bf16.msra.mxu1 %v2466_v3  ;;  %v2493_v3 = vld [vmem:[%s3288_s11 + $0x118] ss:$28 sps:$4 sm:$0xff]  }
  0x4e   : > { %2305 = vmatprep.subr.bf16.mxu1 %v2651_v44 }
  0x4f   : > { %2249 = vmatpush3.bf16.msra.mxu0 %v2459_v59  ;;  %v2479_v59 = vld [vmem:[%s3286_s9 + $0x8] sm:$0xff]  }
  0x50   : > { %2250 = vmatprep.subr.bf16.mxu0 %v2460_v60  ;;  %v2480_v60 = vld [vmem:[%s3286_s9] sm:$0xff]  }
  0x51   : > { %2306 = vmatpush3.bf16.msra.mxu1 %v2467_v4  ;;  %v2501_v4 = vld [vmem:[%s3288_s11 + $0xe4] ss:$28 sps:$4 sm:$0xff]  }
  0x52   : > { %2307 = vmatprep.subr.bf16.mxu1 %v2651_v44 }
  0x53   : > { %2251 = vmatpush3.bf16.msra.mxu0 %v2461_v61  ;;  %v2481_v61 = vld [vmem:[%s3288_s11 + $0x188] ss:$28 sps:$4 sm:$0xff]  }
  0x54   : > { %2317 = vmatprep.subr.bf16.mxu0 %v2651_v44 }
  0x55   : > { %2308 = vmatpush3.bf16.msra.mxu1 %v2468_v5  ;;  %v2499_v5 = vld [vmem:[%s3288_s11 + $0xe0] ss:$28 sps:$4 sm:$0xff]  }
  0x56   : > { %970 = vmatmul.mubr.bf16.vlgmr.msra.gmra.mxu0 %v451_v63  ;;  %2309 = vmatprep.subr.bf16.mxu1 %v2651_v44  ;;  %v2486_v63 = vld [vmem:[%s3288_s11 + $0x194] ss:$28 sps:$4 sm:$0xff]  }
  0x57   : > { %2325 = vmatprep.mubr.msk.bf16.mxu0 %vm2652_vm0, %v2651_v44  ;;  %2318 = vmatpush3.bf16.msra.mxu0 %v2471_v8  ;;  %v2513_v8 = vld [vmem:[%s3288_s11 + $0x74] ss:$28 sps:$4 sm:$0xff]  }
  0x58   : > { %2319 = vmatprep.subr.bf16.mxu0 %v2651_v44 }
  0x59   : > { %2310 = vmatpush3.bf16.msra.mxu1 %v2469_v6  ;;  %v2507_v6 = vld [vmem:[%s3288_s11 + $0xac] ss:$28 sps:$4 sm:$0xff]  }
  0x5a   : > { %2311 = vmatprep.subr.bf16.mxu1 %v2651_v44 }
  0x5b   : > { %2320 = vmatpush3.bf16.msra.mxu0 %v2472_v9  ;;  %v2511_v9 = vld [vmem:[%s3288_s11 + $0x70] ss:$28 sps:$4 sm:$0xff]  }
  0x5c   : > { %2321 = vmatprep.subr.bf16.mxu0 %v2651_v44 }
  0x5d   : > { %2312 = vmatpush3.bf16.msra.mxu1 %v2470_v7  ;;  %v2505_v7 = vld [vmem:[%s3288_s11 + $0xa8] ss:$28 sps:$4 sm:$0xff]  }
  0x5e   : > { %2329 = vmatprep.subr.bf16.mxu1 %v2651_v44 }
  0x5f   : > { %2322 = vmatpush3.bf16.msra.mxu0 %v2473_v36  ;;  %v2526_v36 = vld [vmem:[%s3288_s11 + $0x8] ss:$28 sps:$4 sm:$0xff]  }
  0x60   : > { %2323 = vmatprep.subr.bf16.mxu0 %v2651_v44 }
  0x63   : > { %2324 = vmatpush3.bf16.msra.mxu0 %v2474_v37  ;;  %v2531_v37 = vld [vmem:[%s3288_s11 + $0x19c] ss:$28 sps:$4 sm:$0xff]  }
  0x64   : > { %2337 = vmatprep.subr.bf16.mxu0 %v2651_v44 }
  0xf6   : > { %v2208_v10 = vpop.f32.mrf.mxu0 }
  0xf8   : > { %v2209_v11 = vpop.f32.mrf.mxu0  ;;  %v2230_v12 = vpop.f32.mrf.mxu1 }
  0xf9   : > { %v2210_v22 = vadd.f32 %v2209_v11, %v2208_v10  ;;  %v2519_v10 = vld [vmem:[%s3288_s11 + $0x3c] ss:$28 sps:$4 sm:$0xff]  }
  0xfa   : > { %v2211_v13 = vpop.f32.mrf.mxu0  ;;  %v2231_v14 = vpop.f32.mrf.mxu1  ;;  %v2517_v11 = vld [vmem:[%s3288_s11 + $0x38] ss:$28 sps:$4 sm:$0xff]  }
  0xfb   : > { %v892_v24 = vadd.f32 %v2210_v22, %v2050_v23  ;;  %v2232_v25 = vadd.f32 %v2231_v14, %v2230_v12  ;;  %v2116_v12 = vld [vmem:[%s3285_s8] ss:$0 sm:$0xff]  ;;  %v2490_v22 = vld [vmem:[%s3288_s11 + $0x158] ss:$28 sps:$4 sm:$0xff]  }
  0xfc   : > { %v2212_v15 = vpop.f32.mrf.mxu0  ;;  %v2233_v16 = vpop.f32.mrf.mxu1  ;;  %v2498_v23 = vld [vmem:[%s3288_s11 + $0x124] ss:$28 sps:$4 sm:$0xff]  }
  0xfd   : > { %v932_v28 = vadd.f32 %v2232_v25, %v892_v24  ;;  %v2496_v24 = vld [vmem:[%s3288_s11 + $0x120] ss:$28 sps:$4 sm:$0xff]   ;;  %v2504_v25 = vld [vmem:[%s3288_s11 + $0xec] ss:$28 sps:$4 sm:$0xff]  }
  0xfe   : > { %v2234_v17 = vpop.f32.mrf.mxu1 }
 0x100   : > { %v1011_v18 = vpop.f32.mrf.mxu1 }
 0x102   : > { %v2295_v19 = vpop.f32.mrf.mxu1 }
 0x104   : > { %v1014_v20 = vpop.f32.mrf.mxu1 }
 0x105   : > { %v2492_v20 = vld [vmem:[%s3288_s11 + $0x15c] ss:$28 sps:$4 sm:$0xff]  }
 0x106   : > { %v2296_v21 = vpop.f32.mrf.mxu1 }
 0x116   : > { %v2252_v26 = vpop.f32.mrf.mxu0 }
 0x118   : > { %v2253_v27 = vpop.f32.mrf.mxu0 }
 0x119   : > { %v2254_v29 = vadd.f32 %v2253_v27, %v2252_v26  ;;  %v2502_v26 = vld [vmem:[%s3288_s11 + $0xe8] ss:$28 sps:$4 sm:$0xff]   ;;  %v2510_v27 = vld [vmem:[%s3288_s11 + $0xb4] ss:$28 sps:$4 sm:$0xff]  }
 0x11a   : > { %v2255_v30 = vpop.f32.mrf.mxu0 }
 0x11b   : > { %v972_v31 = vadd.f32 %v2254_v29, %v932_v28  ;;  %v2508_v28 = vld [vmem:[%s3288_s11 + $0xb0] ss:$28 sps:$4 sm:$0xff]   ;;  %v2516_v29 = vld [vmem:[%s3288_s11 + $0x7c] ss:$28 sps:$4 sm:$0xff]  }
 0x11c   : > { %v2256_v32 = vpop.f32.mrf.mxu0  ;;  %v2514_v30 = vld [vmem:[%s3288_s11 + $0x78] ss:$28 sps:$4 sm:$0xff]  }
 0x11d   : > { %v1012_v33 = vadd.f32 %v1011_v18, %v972_v31  ;;  %v2484_v18 = vld [vmem:[%s3288_s11 + $0x190] ss:$28 sps:$4 sm:$0xff]   ;;  %v2522_v31 = vld [vmem:[%s3288_s11 + $0x44] ss:$28 sps:$4 sm:$0xff]  }
 0x11e   : > { %v2520_v32 = vld [vmem:[%s3288_s11 + $0x40] ss:$28 sps:$4 sm:$0xff]  }
 0x11f   : > { %v1017_v34 = vmax.f32 %v1012_v33, 0.0  ;;  %v2525_v33 = vld [vmem:[%s3288_s11 + $0x4] ss:$28 sps:$4 sm:$0xff]  }
 0x121   : > { %v1018_v35 = vpack.c.bf16 %v1017_v34, %v1017_v34  ;;  %v2528_v34 = vld [vmem:[%s3288_s11 + $0xc] ss:$28 sps:$4 sm:$0xff]  }
 0x123   : > { %2314 = vmatmul.mubr.bf16.vlgmr.msra.gmra.mxu1 %v1018_v35  ;;  %v2523_v35 = vld [vmem:[%s3288_s11] ss:$28 sps:$4 sm:$0xff]  }
 0x124   : > { %2333 = vmatprep.mubr.msk.bf16.mxu1 %vm2652_vm0, %v2651_v44  ;;  %2330 = vmatpush3.bf16.msra.mxu1 %v2475_v38  ;;  %v2653_v38 = vmov 0  }
 0x125   : > { %2331 = vmatprep.subr.bf16.mxu1 %v2651_v44 }
 0x128   : > { %2332 = vmatpush3.bf16.msra.mxu1 %v2476_v48 }
 0x129   : > { %1759 = vmatprep.subr.bf16.mxu1 %v2483_v62  ;;  %v2551_v62 = vld [vmem:[%s3288_s11 + $0x84] ss:$28 sps:$4 sm:$0xff]  }
 0x1e3   : > { %v1124_v40 = vpop.f32.mrf.mxu1 }
 0x1e4   : > { %v1125_v41 = vadd.f32 %v2101_v39, %v1124_v40  ;;  %v2120_v39 = vld [vmem:[%s3287_s10] ss:$0 sm:$0xff] }
 0x1e5   : > { %v2315_v42 = vpop.f32.mrf.mxu1 }
 0x1e6   : > { %v1130_v43 = vmax.f32 %v1125_v41, 0.0 }
 0x1e7   : > { %v1127_v45 = vpop.f32.mrf.mxu1 }
 0x1e8   : > { %v1131_v46 = vpack.c.bf16 %v1130_v43, %v1130_v43 }
 0x1e9   : > { %v2316_v47 = vpop.f32.mrf.mxu1 }
 0x1ea   : > { %2326 = vmatmul.mubr.msk.bf16.vlgmr.msra.gmra.mxu0 %vm1171_vm2, %v1131_v46  ;;  %v2529_v46 = vld [vmem:[%s3288_s11 + $0x198] ss:$28 sps:$4 sm:$0xff]   ;;  %v2532_v47 = vld [vmem:[%s3288_s11 + $0x1a0] ss:$28 sps:$4 sm:$0xff]  }
 0x1eb   : > { %2345 = vmatprep.mubr.msk.bf16.mxu0 %vm2652_vm0, %v2651_v44  ;;  %2338 = vmatpush3.bf16.msra.mxu0 %v2477_v49  ;;  %v2535_v49 = vld [vmem:[%s3288_s11 + $0x164] ss:$28 sps:$4 sm:$0xff]  }
 0x1ec   : > { %2339 = vmatprep.subr.bf16.mxu0 %v2651_v44 }
 0x1ef   : > { %2340 = vmatpush3.bf16.msra.mxu0 %v2478_v50 }
 0x1f0   : > { %2341 = vmatprep.subr.bf16.mxu0 %v2651_v44 }
 0x1f3   : > { %2342 = vmatpush3.bf16.msra.mxu0 %v2479_v59  ;;  %v2547_v59 = vld [vmem:[%s3288_s11 + $0xbc] ss:$28 sps:$4 sm:$0xff]  }
 0x1f4   : > { %2343 = vmatprep.subr.bf16.mxu0 %v2651_v44 }
 0x1f7   : > { %2344 = vmatpush3.bf16.msra.mxu0 %v2480_v60  ;;  %v2545_v60 = vld [vmem:[%s3288_s11 + $0xb8] ss:$28 sps:$4 sm:$0xff]  }
 0x1f8   : > { %1800 = vmatprep.subr.bf16.mxu0 %v2486_v63  ;;  %v2549_v63 = vld [vmem:[%s3288_s11 + $0x80] ss:$28 sps:$4 sm:$0xff]  }
 0x2aa   : > { %v1209_v52 = vpop.f32.mrf.mxu0 }
 0x2ab   : > { %v1210_v53 = vadd.f32 %v2110_v51, %v1209_v52  ;;  %v2533_v51 = vld [vmem:[%s3288_s11 + $0x160] ss:$28 sps:$4 sm:$0xff]   ;;  %v2536_v52 = vld [vmem:[%s3288_s11 + $0x168] ss:$28 sps:$4 sm:$0xff]  }
 0x2ac   : > { %v2327_v54 = vpop.f32.mrf.mxu0 }
 0x2ad   : > { %v1215_v55 = vmax.f32 %v1210_v53, 0.0  ;;  %v2539_v53 = vld [vmem:[%s3288_s11 + $0x12c] ss:$28 sps:$4 sm:$0xff]  }
 0x2ae   : > { %v1212_v56 = vpop.f32.mrf.mxu0  ;;  %v2537_v54 = vld [vmem:[%s3288_s11 + $0x128] ss:$28 sps:$4 sm:$0xff]  }
 0x2af   : > { %v1216_v57 = vpack.c.bf16 %v1215_v55, %v1215_v55  ;;  %v2540_v55 = vld [vmem:[%s3288_s11 + $0x130] ss:$28 sps:$4 sm:$0xff]  }
 0x2b0   : > { %v2328_v58 = vpop.f32.mrf.mxu0  ;;  %v2543_v56 = vld [vmem:[%s3288_s11 + $0xf4] ss:$28 sps:$4 sm:$0xff]  }
 0x2b1   : > { %2334 = vmatmul.mubr.msk.bf16.vlgmr.msra.gmra.mxu1 %vm1240_vm3, %v1216_v57  ;;  %v2541_v57 = vld [vmem:[%s3288_s11 + $0xf0] ss:$28 sps:$4 sm:$0xff]   ;;  %v2544_v58 = vld [vmem:[%s3288_s11 + $0xf8] ss:$28 sps:$4 sm:$0xff]  }
 0x2b2   : > { %1760 = vmatpush1.bf16.msra.mxu1 %v2481_v61  ;;  %1791 = vmatprep.mubr.bf16.mxu1 %v2653_v38  ;;  %v2548_v61 = vld [vmem:[%s3288_s11 + $0xc0] ss:$28 sps:$4 sm:$0xff]  }
 0x2b3   : > { %1761 = vmatprep.subr.bf16.mxu1 %v2489_v0  ;;  %v2552_v0 = vld [vmem:[%s3288_s11 + $0x88] ss:$28 sps:$4 sm:$0xff]  }
 0x2b6   : > { %1762 = vmatpush1.bf16.msra.mxu1 %v2487_v1  ;;  %v2555_v1 = vld [vmem:[%s3288_s11 + $0x4c] ss:$28 sps:$4 sm:$0xff]  }
 0x2b7   : > { %1763 = vmatprep.subr.bf16.mxu1 %v2495_v2  ;;  %v2553_v2 = vld [vmem:[%s3288_s11 + $0x48] ss:$28 sps:$4 sm:$0xff]  }
 0x2ba   : > { %1764 = vmatpush1.bf16.msra.mxu1 %v2493_v3  ;;  %v2556_v3 = vld [vmem:[%s3288_s11 + $0x50] ss:$28 sps:$4 sm:$0xff]  }
 0x2bb   : > { %1765 = vmatprep.subr.bf16.mxu1 %v2501_v4  ;;  %v2559_v4 = vld [vmem:[%s3288_s11 + $0x14] ss:$28 sps:$4 sm:$0xff]  }
 0x2be   : > { %1766 = vmatpush1.bf16.msra.mxu1 %v2499_v5  ;;  %v2557_v5 = vld [vmem:[%s3288_s11 + $0x10] ss:$28 sps:$4 sm:$0xff]  }
 0x2bf   : > { %1767 = vmatprep.subr.bf16.mxu1 %v2507_v6  ;;  %v2560_v6 = vld [vmem:[%s3288_s11 + $0x18] ss:$28 sps:$4 sm:$0xff]  }
 0x2c2   : > { %1768 = vmatpush1.bf16.msra.mxu1 %v2505_v7  ;;  %v1436_v7 = vlaneseq }
 0x2c3   : > { %1769 = vmatprep.subr.bf16.mxu1 %v2513_v8 }
 0x2c4   : > { %v1437_v8 = vshrl.u32 %v1436_v7, 7 }
 0x2c6   : > { %1770 = vmatpush1.bf16.msra.mxu1 %v2511_v9  ;;  %v1438_v9 = vsub.s32 0, %v1437_v8 }
 0x2c7   : > { %1771 = vmatprep.subr.bf16.mxu1 %v2519_v10  ;;  %v1446_v10 = vsub.s32 2, %v1437_v8 }
 0x2ca   : > { %1772 = vmatpush1.bf16.msra.mxu1 %v2517_v11  ;;  %v1434_v11 = vld [vmem:[%s3289_s12] sm:$0x7f] }
 0x2cb   : > { %1773 = vmatprep.subr.bf16.mxu1 %v2525_v33 }
 0x2ce   : > { %1774 = vmatpush1.bf16.msra.mxu1 %v2523_v35 }
 0x2cf   : > { %1841 = vmatprep.subr.bf16.mxu1 %v2531_v37 }
 0x371   : > { %v1278_v13 = vpop.f32.mrf.mxu1 }
 0x372   : > { %v1279_v14 = vadd.f32 %v2116_v12, %v1278_v13  ;;  %v1442_v12 = vsub.s32 1, %v1437_v8  ;;  %v1450_v13 = vsub.s32 3, %v1437_v8 }
 0x373   : > { %v2335_v15 = vpop.f32.mrf.mxu1 }
 0x374   : > { %v1284_v16 = vmax.f32 %v1279_v14, 0.0  ;;  %v1439_v14 = vrot.slane %v1434_v11, %v1438_v9  ;;  %v1447_v15 = vrot.slane %v1434_v11, %v1446_v10 }
 0x375   : > { %v1281_v17 = vpop.f32.mrf.mxu1 }
 0x376   : > { %v1285_v19 = vpack.c.bf16 %v1284_v16, %v1284_v16  ;;  %v1443_v16 = vrot.slane %v1434_v11, %v1442_v12  ;;  %v1451_v17 = vrot.slane %v1434_v11, %v1450_v13 }
 0x377   : > { %v2336_v21 = vpop.f32.mrf.mxu1 }
 0x378   : > { %2346 = vmatmul.mubr.msk.bf16.vlgmr.msra.gmra.mxu0 %vm1171_vm2, %v1285_v19 }
 0x379   : > { %1801 = vmatpush1.bf16.msra.mxu0 %v2484_v18  ;;  %1832 = vmatprep.mubr.bf16.mxu0 %v2653_v38 }
 0x37a   : > { %1802 = vmatprep.subr.bf16.mxu0 %v2492_v20 }
 0x37d   : > { %1803 = vmatpush1.bf16.msra.mxu0 %v2490_v22 }
 0x37e   : > { %1804 = vmatprep.subr.bf16.mxu0 %v2498_v23 }
 0x381   : > { %1805 = vmatpush1.bf16.msra.mxu0 %v2496_v24 }
 0x382   : > { %1806 = vmatprep.subr.bf16.mxu0 %v2504_v25 }
 0x385   : > { %1807 = vmatpush1.bf16.msra.mxu0 %v2502_v26 }
 0x386   : > { %1808 = vmatprep.subr.bf16.mxu0 %v2510_v27 }
 0x389   : > { %1809 = vmatpush1.bf16.msra.mxu0 %v2508_v28 }
 0x38a   : > { %1810 = vmatprep.subr.bf16.mxu0 %v2516_v29 }
 0x38d   : > { %1811 = vmatpush1.bf16.msra.mxu0 %v2514_v30 }
 0x38e   : > { %1812 = vmatprep.subr.bf16.mxu0 %v2522_v31 }
 0x391   : > { %1813 = vmatpush1.bf16.msra.mxu0 %v2520_v32 }
 0x392   : > { %1814 = vmatprep.subr.bf16.mxu0 %v2528_v34 }
 0x395   : > { %1815 = vmatpush1.bf16.msra.mxu0 %v2526_v36 }
 0x396   : > { %2349 = vmatprep.subr.bf16.mxu0 %v2651_v44 }
 0x438   : > { %v1362_v40 = vpop.f32.mrf.mxu0 }
 0x439   : > { %v1363_v41 = vadd.f32 %v2120_v39, %v1362_v40 }
 0x43a   : > { %v2347_v42 = vpop.f32.mrf.mxu0 }
 0x43b   : > { %v1368_v43 = vmax.f32 %v1363_v41, 0.0  ;;  %v1454_v41 = vsub.s32 4, %v1437_v8  ;;  %v1462_v42 = vsub.s32 6, %v1437_v8 }
 0x43c   : > { %v1365_v45 = vpop.f32.mrf.mxu0 }
 0x43d   : > { %v1369_v48 = vpack.c.bf16 %v1368_v43, %v1368_v43  ;;  %v1458_v43 = vsub.s32 5, %v1437_v8  ;;  %v1455_v45 = vrot.slane %v1434_v11, %v1454_v41 }
 0x43e   : > { %v2348_v50 = vpop.f32.mrf.mxu0 }
 0x43f   : > { %1792 = vmatmul.mubr.bf16.vlgmr.msra.gmra.mxu1 %v1369_v48  ;;  %1833 = vmatmul.mubr.bf16.vlgmr.msra.gmra.mxu0 %v1369_v48 }
 0x440   : > { %1842 = vmatpush1.bf16.msra.mxu1 %v2529_v46  ;;  %2350 = vmatpush3.bf16.msra.mxu0 %v2532_v47  ;;  %v1463_v46 = vrot.slane %v1434_v11, %v1462_v42  ;;  %v1459_v47 = vrot.slane %v1434_v11, %v1458_v43 }
 0x441   : > { %1843 = vmatprep.subr.bf16.mxu1 %v2535_v49  ;;  %2351 = vmatprep.subr.bf16.mxu0 %v2651_v44 }
 0x442   : > { %1873 = vmatprep.mubr.bf16.mxu1 %v2653_v38  ;;  %2365 = vmatprep.mubr.msk.bf16.mxu0 %vm2652_vm0, %v2651_v44 }
 0x444   : > { %1844 = vmatpush1.bf16.msra.mxu1 %v2533_v51  ;;  %2352 = vmatpush3.bf16.msra.mxu0 %v2536_v52 }
 0x445   : > { %1845 = vmatprep.subr.bf16.mxu1 %v2539_v53  ;;  %2353 = vmatprep.subr.bf16.mxu0 %v2651_v44 }
 0x448   : > { %1846 = vmatpush1.bf16.msra.mxu1 %v2537_v54  ;;  %2354 = vmatpush3.bf16.msra.mxu0 %v2540_v55 }
 0x449   : > { %1847 = vmatprep.subr.bf16.mxu1 %v2543_v56  ;;  %2355 = vmatprep.subr.bf16.mxu0 %v2651_v44 }
 0x44c   : > { %1848 = vmatpush1.bf16.msra.mxu1 %v2541_v57  ;;  %2356 = vmatpush3.bf16.msra.mxu0 %v2544_v58 }
 0x44d   : > { %1849 = vmatprep.subr.bf16.mxu1 %v2547_v59  ;;  %2357 = vmatprep.subr.bf16.mxu0 %v2651_v44 }
 0x450   : > { %1850 = vmatpush1.bf16.msra.mxu1 %v2545_v60  ;;  %2358 = vmatpush3.bf16.msra.mxu0 %v2548_v61 }
 0x451   : > { %1851 = vmatprep.subr.bf16.mxu1 %v2551_v62  ;;  %2359 = vmatprep.subr.bf16.mxu0 %v2651_v44 }
 0x454   : > { %1852 = vmatpush1.bf16.msra.mxu1 %v2549_v63  ;;  %2360 = vmatpush3.bf16.msra.mxu0 %v2552_v0 }
 0x455   : > { %1853 = vmatprep.subr.bf16.mxu1 %v2555_v1  ;;  %2361 = vmatprep.subr.bf16.mxu0 %v2651_v44 }
 0x458   : > { %1854 = vmatpush1.bf16.msra.mxu1 %v2553_v2  ;;  %2362 = vmatpush3.bf16.msra.mxu0 %v2556_v3 }
 0x459   : > { %1855 = vmatprep.subr.bf16.mxu1 %v2559_v4  ;;  %2363 = vmatprep.subr.bf16.mxu0 %v2651_v44 }
 0x45c   : > { %1856 = vmatpush1.bf16.msra.mxu1 %v2557_v5  ;;  %2364 = vmatpush3.bf16.msra.mxu0 %v2560_v6 }
 0x45f   : > { %1874 = vmatmul.mubr.bf16.vlgmr.msra.gmra.mxu1 %v1369_v48  ;;  %2366 = vmatmul.mubr.bf16.vlgmr.msra.gmra.mxu0 %v1369_v48 }
 0x4ff   : > { %v1793_v18 = vpop.f32.mrf.mxu1  ;;  %v1834_v44 = vpop.f32.mrf.mxu0 }
 0x500   : > { %v1794_v19 = vadd.f32 %v1793_v18, %v1439_v14  ;;  %v1835_v20 = vadd.f32 %v1834_v44, %v1447_v15 }
 0x501   : > { %v1795_v21 = vpop.f32.mrf.mxu1  ;;  %v1836_v22 = vpop.f32.mrf.mxu0 }
 0x502   : > { %v2182_v23 = vmul.f32 -1.442695, %v1794_v19  ;;  %v2184_v24 = vmul.f32 -1.442695, %v1835_v20  ;;  %v1796_v25 = vadd.f32 %v1795_v21, %v1443_v16  ;;  %v1837_v26 = vadd.f32 %v1836_v22, %v1451_v17 }
 0x503   : > { %v1797_v27 = vpop.f32.mrf.mxu1  ;;  %v1838_v28 = vpop.f32.mrf.mxu0 }
 0x504   : > { %2561 = vpow2.f32 %v2182_v23  ;;  %v2183_v29 = vmul.f32 -1.442695, %v1796_v25  ;;  %v2185_v30 = vmul.f32 -1.442695, %v1837_v26 }
 0x505   : > { %2563 = vpow2.f32 %v2184_v24  ;;  %v1798_v31 = vpop.f32.mrf.mxu1  ;;  %v1839_v32 = vpop.f32.mrf.mxu0 }
 0x506   : > { %2565 = vpow2.f32 %v2183_v29 }
 0x507   : > { %2567 = vpow2.f32 %v2185_v30 }
 0x511   : > { %v2562_v33 = vpop.eup %2561 }
 0x512   : > { %v2564_v34 = vpop.eup %2563  ;;  %v1943_v35 = vadd.f32 1.0, %v2562_v33 }
 0x513   : > { %v2566_v36 = vpop.eup %2565  ;;  %v1945_v37 = vadd.f32 1.0, %v2564_v34 }
 0x514   : > { %v2568_v38 = vpop.eup %2567  ;;  %2569 = vrcp.f32 %v1943_v35  ;;  %v1944_v39 = vadd.f32 1.0, %v2566_v36 }
 0x515   : > { %2571 = vrcp.f32 %v1945_v37  ;;  %v1946_v40 = vadd.f32 1.0, %v2568_v38 }
 0x516   : > { %2573 = vrcp.f32 %v1944_v39 }
 0x517   : > { %2575 = vrcp.f32 %v1946_v40 }
 0x51f   : > { %v1875_v48 = vpop.f32.mrf.mxu1  ;;  %v1916_v49 = vpop.f32.mrf.mxu0 }
 0x520   : > { %v1876_v50 = vadd.f32 %v1875_v48, %v1455_v45  ;;  %v1917_v51 = vadd.f32 %v1916_v49, %v1463_v46 }
 0x521   : > { %v2570_v52 = vpop.eup %2569  ;;  %v1877_v53 = vpop.f32.mrf.mxu1 }
 0x522   : > { %v2367_v54 = vpop.f32.mrf.mxu0  ;;  %v2572_v55 = vpop.eup %2571  ;;  %1964 = vst [vmem:[%s3219_s17] sm:$0xff] %v2570_v52  ;;  %v2186_v56 = vmul.f32 -1.442695, %v1876_v50  ;;  %v2188_v57 = vmul.f32 -1.442695, %v1917_v51  ;;  %v1878_v58 = vadd.f32 %v1877_v53, %v1459_v47 }
 0x523   : > { %v2574_v59 = vpop.eup %2573  ;;  %1966 = vst [vmem:[%s3219_s17 + $0x10] sm:$0xff] %v2572_v55  ;;  %v1879_v60 = vpop.f32.mrf.mxu1 }
 0x524   : > { %v1919_v61 = vpop.f32.mrf.mxu0  ;;  %v2576_v62 = vpop.eup %2575  ;;  %1965 = vst [vmem:[%s3219_s17 + $0x8] sm:$0xff] %v2574_v59  ;;  %2577 = vpow2.f32 %v2186_v56  ;;  %v2187_v63 = vmul.f32 -1.442695, %v1878_v58 }
 0x525   : > { %1967 = vst [vmem:[%s3219_s17 + $0x18] sm:$0xff] %v2576_v62  ;;  %2579 = vpow2.f32 %v2188_v57  ;;  %v1880_v0 = vpop.f32.mrf.mxu1 }
 0x526   : > { %v2368_v1 = vpop.f32.mrf.mxu0  ;;  %2581 = vpow2.f32 %v2187_v63 }
 0x531   : > { %v2578_v2 = vpop.eup %2577 }
 0x532   : > { %v2580_v3 = vpop.eup %2579  ;;  %v1947_v4 = vadd.f32 1.0, %v2578_v2 }
 0x533   : > { %v2582_v5 = vpop.eup %2581  ;;  %v1949_v6 = vadd.f32 1.0, %v2580_v3 }
 0x534   : > { %2583 = vrcp.f32 %v1947_v4  ;;  %v1948_v7 = vadd.f32 1.0, %v2582_v5 }
 0x535   : > { %2585 = vrcp.f32 %v1949_v6 }
 0x536   : > { %2587 = vrcp.f32 %v1948_v7 }
 0x541   : > { %v2584_v8 = vpop.eup %2583 }
 0x542   : > { %v2586_v9 = vpop.eup %2585  ;;  %1968 = vst [vmem:[%s3219_s17 + $0x20] sm:$0xff] %v2584_v8 }
 0x543   : > { %v2588_v10 = vpop.eup %2587  ;;  %1970 = vst.msk [vmem:[%s3219_s17 + $0x30] sm:$0xff] %vm853_vm1, %v2586_v9 }
 0x544   : > { %1969 = vst [vmem:[%s3219_s17 + $0x28] sm:$0xff] %v2588_v10 }
 0x545   : > { %2602 = shalt.err (!%p2599_p3)
}
 0x546   : > { %s2603_s17 = scalar_lea.hbm %s3231_s30, 896  ;;  %s2607_s23 = scalar_lea.hbm %s3290_s13, 1792 }
 0x547   : > { %p2604_p4 = scmp.ne.s32.totalorder %s3231_s30, %s2603_s17  ;;  %p2608_p9 = scmp.lt.s32.totalorder %s3231_s30, %s3290_s13 }
 0x548   : > { %p2609_p10 = scmp.lt.s32.totalorder %s2607_s23, %s2603_s17 }
 0x549   : > { %p2605_p7 = pnand %p2604_p4, %p2763_p5 }
 0x54a   : > { %p2610_p11 = por %p2609_p10, %p2608_p9 }
 0x54b   : > { %p2606_p8 = pneg %p2605_p7 }
 0x54d   : > { %p2611_p12 = pnand %p2610_p11, %p2606_p8 }
 0x54f   : > { %2614 = shalt.err (!%p2611_p12)
}
 0x550   : > { %2372 = dma.vmem_to_hbm [thread:$0]  (%p2763_p5), %s3233_s20, 896, %s3231_s30, %s1972_s29  }
 0x551 PF: > { %p2378_p13 = scmp.ge.s32.totalorder %s2649_s28, 2  ;;  %s1998_s15 = sand.u32 1, %s2637_s25  }
 0x552   : > { %s1999_s21 = scalar_lea.sflag [#allocation3], %s1998_s15 }
 0x553   : > { %p2375_p0 = pnand %p2378_p13, %p2767_p6 }
 0x555   : > { %p2376_p1 = pneg %p2375_p0 }
 0x557   : > { %2632 = dma.done.wait (%p2376_p1), %s1999_s21, 896  }
 0x558   : > { %2634 = vsyncadd (%p2376_p1), %s1999_s21, 4294966400  ;;  %s3299_s28 = sld [smem:[#allocation6_spill]]  ;;  %s3302_s25 = smov %s2641_s26 }
 0x559   : > { %s3300_s27 = sld [smem:[#allocation5_spill]] }
 0x55a   : > { %s3301_s17 = sld [smem:[#allocation7_spill]] }
 0x55e   : > { %p23_p2 = scmp.ge.s32.totalorder %s3299_s28, 4  }
 0x55f   : > { %s3303_s26 = smov %s3300_s27 }
 0x560   : > { %s3304_s27 = smov %s3301_s17  ;;  %25 = sbr.rel (!%p23_p2) target bundleno = 3 (0x3), region = 107 }
 0x565   :  { %2004 = vsyncpa [#allocation3], 1 }
 0x566   :  { %2006 = vsyncpa [#allocation3 + $0x1], 1 }

</bundles_post_ra>
